<compile_context>
chip_gen: v6e
topology: v6e:2x2x1
jax: 0.10.0
libtpu: 0.0.40
codegen_flags: <defaults>
</compile_context>

<pallas_src>
import jax
import jax.numpy as jnp
from jax.experimental import pallas as pl
from jax.experimental.pallas import tpu as pltpu

# ----- configuration (mirrors SharedNet.__init__) -----
CONFIG = dict(conv1_num_filter=8, conv2_num_filter=16,
              conv1_kernel_size=3, conv2_kernel_size=3, fc_len=32)
INPUT_LEN = 32
BATCH = 2
CIN = 2
C1 = CONFIG['conv1_num_filter']
C2 = CONFIG['conv2_num_filter']
K1 = CONFIG['conv1_kernel_size']
K2 = CONFIG['conv2_kernel_size']
FC = CONFIG['fc_len']
L0 = INPUT_LEN
L1 = L0 - K1 + 1          # conv1 'valid' output length        = 30
L1P = L1 // 2             # after maxpool(2, stride=2)         = 15
L2 = L1P - K2 + 1         # conv2 'valid' output length        = 13
L2P = L2 // 2             # after maxpool(2, stride=2)         = 6  (== linear_input)
EPS = 1e-5

N1 = BATCH * L1           # conv1 rows (batch-stacked, compact)          = 60
NP1 = BATCH * L1P         # pool1 rows                                   = 30
N2R = L1P + L2            # conv2 rows on the batch-stacked grid (junk rows 13,14) = 28
NP2 = BATCH * L2P         # pool2 rows ((l, b)-interleaved)              = 12

# ----- packed parameter blob layout (width = FC = 32) -----
ROW_WF = 0                          # (L2P*C2, FC) = (96, 32)
ROW_W2 = ROW_WF + L2P * C2          # (K2*C1, C2)  = (24, 16)
ROW_W1 = ROW_W2 + K2 * C1           # (K1*CIN, C1) = (6, 8)
ROW_B1 = ROW_W1 + K1 * CIN          # 126
ROW_G1 = ROW_B1 + 1
ROW_BE1 = ROW_G1 + 1
ROW_B2 = ROW_BE1 + 1
ROW_G2 = ROW_B2 + 1
ROW_BE2 = ROW_G2 + 1
ROW_BF = ROW_BE2 + 1                # 132
PBLOB_ROWS = 136                    # padded to a multiple of 8


def shared_net_kernel(xc_ref, mic_ref, mc1_ref, mc2_ref, p_ref, out_ref):
    # ---- parameter views (static sub-tile reads of the packed VMEM blob) ----
    w1 = p_ref[ROW_W1:ROW_W1 + K1 * CIN, 0:C1]            # (6, C1)
    b1 = p_ref[ROW_B1:ROW_B1 + 1, 0:C1]                   # (1, C1)
    g1 = p_ref[ROW_G1:ROW_G1 + 1, 0:C1]
    be1 = p_ref[ROW_BE1:ROW_BE1 + 1, 0:C1]
    b2 = p_ref[ROW_B2:ROW_B2 + 1, 0:C2]
    g2 = p_ref[ROW_G2:ROW_G2 + 1, 0:C2]
    be2 = p_ref[ROW_BE2:ROW_BE2 + 1, 0:C2]
    bf = p_ref[ROW_BF:ROW_BF + 1, 0:FC]

    # ---- conv1: masked, pre-im2col'ed input -> one MXU matmul ----
    xm = xc_ref[...] * mic_ref[...]                                        # (60, 6)
    y = jnp.dot(xm, w1, preferred_element_type=jnp.float32) + b1           # (60, C1)

    # ---- bn1 (training batch stats, single fused pass) + relu ----
    inv_n1 = 1.0 / float(BATCH * L1)
    mean1 = jnp.sum(y, axis=0, keepdims=True) * inv_n1
    ex2_1 = jnp.sum(y * y, axis=0, keepdims=True) * inv_n1
    sc1 = g1 * jax.lax.rsqrt(ex2_1 - mean1 * mean1 + EPS)
    y = jnp.maximum(y * sc1 + (be1 - mean1 * sc1), 0.0)

    # ---- maxpool(2,2) #1: pairwise max + even-row compaction via 0/1 matmul ----
    pm1 = jnp.maximum(y[0:N1 - 1, :], y[1:N1, :])                          # (59, C1)
    r1 = jax.lax.broadcasted_iota(jnp.int32, (NP1, N1 - 1), 0)
    c1 = jax.lax.broadcasted_iota(jnp.int32, (NP1, N1 - 1), 1)
    s1 = jnp.where(c1 == 2 * r1, 1.0, 0.0)                                 # (30, 59)
    h = jnp.dot(s1, pm1, preferred_element_type=jnp.float32) * mc1_ref[...]  # (30, C1)

    # ---- conv2: 3 tap matmuls over the batch-stacked rows (rows 13,14 are junk) ----
    y2 = b2
    for k in range(K2):
        wk = p_ref[ROW_W2 + k * C1:ROW_W2 + (k + 1) * C1, 0:C2]            # (C1, C2)
        y2 = y2 + jnp.dot(h[k:k + N2R, :], wk,
                          preferred_element_type=jnp.float32)              # (28, C2)

    # ---- bn2 (stats over valid rows only) + relu ----
    ri = jax.lax.broadcasted_iota(jnp.int32, (N2R, C2), 0)
    valid = jnp.where(jnp.logical_or(ri < L2, ri >= L1P), 1.0, 0.0)
    inv_n2 = 1.0 / float(BATCH * L2)
    y2m = y2 * valid
    mean2 = jnp.sum(y2m, axis=0, keepdims=True) * inv_n2
    ex2_2 = jnp.sum(y2m * y2m, axis=0, keepdims=True) * inv_n2
    sc2 = g2 * jax.lax.rsqrt(ex2_2 - mean2 * mean2 + EPS)
    y2 = jnp.maximum(y2 * sc2 + (be2 - mean2 * sc2), 0.0)

    # ---- maxpool #2: pairwise max + compaction to (l, b)-interleaved rows ----
    pm2 = jnp.maximum(y2[0:N2R - 1, :], y2[1:N2R, :])                      # (27, C2)
    r2 = jax.lax.broadcasted_iota(jnp.int32, (NP2, N2R - 1), 0)
    c2 = jax.lax.broadcasted_iota(jnp.int32, (NP2, N2R - 1), 1)
    tgt = r2 + (L1P - 1) * jnp.bitwise_and(r2, 1)   # row 2l+b -> source 2l + 15*b
    s2 = jnp.where(c2 == tgt, 1.0, 0.0)                                    # (12, 27)
    z = jnp.dot(s2, pm2, preferred_element_type=jnp.float32) * mc2_ref[...]  # (12, C2)

    # ---- fc: torch channel-major flatten folded into wf row order ----
    acc = bf                                                               # (1, FC)
    for l in range(L2P):
        wl = p_ref[ROW_WF + l * C2:ROW_WF + (l + 1) * C2, 0:FC]            # (C2, FC)
        acc = acc + jnp.dot(z[2 * l:2 * l + 2, :], wl,
                            preferred_element_type=jnp.float32)            # (2, FC)
    out_ref[...] = acc


def init_params(key):
    ks = jax.random.split(key, 6)

    def u(k, shape, fan_in):
        bound = 1.0 / float(fan_in) ** 0.5
        return jax.random.uniform(k, shape, jnp.float32, -bound, bound)

    # parameters kept in PyTorch layout; relayout happens in the wrapper.
    w1_t = u(ks[0], (C1, CIN, K1), CIN * K1)
    b1 = u(ks[1], (C1,), CIN * K1)
    w2_t = u(ks[2], (C2, C1, K2), C1 * K2)
    b2 = u(ks[3], (C2,), C1 * K2)
    wf_t = u(ks[4], (FC, C2 * L2P), C2 * L2P)
    bf = u(ks[5], (FC,), C2 * L2P)
    g1 = jnp.ones((C1,), jnp.float32)
    be1 = jnp.zeros((C1,), jnp.float32)
    g2 = jnp.ones((C2,), jnp.float32)
    be2 = jnp.zeros((C2,), jnp.float32)
    return dict(w1_torch=w1_t, b1=b1, g1=g1, be1=be1,
                w2_torch=w2_t, b2=b2, g2=g2, be2=be2,
                wf_torch=wf_t, bf=bf)


def _pack_params(p):
    """Relayout torch-format weights and pack everything into one VMEM blob."""
    w1k = jnp.transpose(p['w1_torch'], (2, 1, 0)).reshape(K1 * CIN, C1)
    w2k = jnp.transpose(p['w2_torch'], (2, 1, 0)).reshape(K2 * C1, C2)
    # torch flatten index is c*L2P + l; kernel rows are (l, c) -> permute.
    wfk = jnp.transpose(p['wf_torch'].reshape(FC, C2, L2P), (2, 1, 0)).reshape(L2P * C2, FC)
    blob = jnp.zeros((PBLOB_ROWS, FC), jnp.float32)
    blob = blob.at[ROW_WF:ROW_WF + L2P * C2, :].set(wfk)
    blob = blob.at[ROW_W2:ROW_W2 + K2 * C1, 0:C2].set(w2k)
    blob = blob.at[ROW_W1:ROW_W1 + K1 * CIN, 0:C1].set(w1k)
    blob = blob.at[ROW_B1, 0:C1].set(p['b1'])
    blob = blob.at[ROW_G1, 0:C1].set(p['g1'])
    blob = blob.at[ROW_BE1, 0:C1].set(p['be1'])
    blob = blob.at[ROW_B2, 0:C2].set(p['b2'])
    blob = blob.at[ROW_G2, 0:C2].set(p['g2'])
    blob = blob.at[ROW_BE2, 0:C2].set(p['be2'])
    blob = blob.at[ROW_BF, 0:FC].set(p['bf'])
    return blob


def _im2col(a, K, Lout):
    """(B, L, C) -> (B*Lout, K*C); column index = k*C + c (wrapper-side, no FLOPs)."""
    cols = jnp.concatenate([a[:, k:k + Lout, :] for k in range(K)], axis=2)
    return cols.reshape(BATCH * Lout, K * a.shape[-1])


def shared_net_forward(x_nlc, mask_input, mask_conv1, mask_conv2, params):
    blob = _pack_params(params)
    xcols = _im2col(x_nlc.astype(jnp.float32), K1, L1)          # (60, 6)
    micols = _im2col(mask_input.astype(jnp.float32), K1, L1)    # (60, 6)
    mc1_f = mask_conv1.reshape(BATCH * L1P, C1).astype(jnp.float32)        # (30, 8)  (b, l)
    mc2_lb = jnp.transpose(mask_conv2, (1, 0, 2)).reshape(L2P * BATCH, C2).astype(jnp.float32)  # (12,16) (l,b)

    vspec = pl.BlockSpec(memory_space=pltpu.MemorySpace.VMEM)
    out = pl.pallas_call(
        shared_net_kernel,
        out_shape=jax.ShapeDtypeStruct((BATCH, FC), jnp.float32),
        in_specs=[vspec] * 5,
        out_specs=vspec,
    )(xcols, micols, mc1_f, mc2_lb, blob)
    return out, mask_input, mask_conv1, mask_conv2


def reference_forward(x_nlc, mi_nlc, mc1_nlc, mc2_nlc, p):
    """Pure-JAX reference in PyTorch's NCL layout (training-mode semantics)."""
    to_ncl = lambda a: jnp.transpose(a, (0, 2, 1))
    dn = ('NCH', 'OIH', 'NCH')

    def bn_train(y, g, b):
        mean = jnp.mean(y, axis=(0, 2), keepdims=True)
        var = jnp.mean((y - mean) ** 2, axis=(0, 2), keepdims=True)
        return (y - mean) / jnp.sqrt(var + EPS) * g[None, :, None] + b[None, :, None]

    def pool(y):
        lout = y.shape[-1] // 2
        return jnp.maximum(y[:, :, 0:2 * lout:2], y[:, :, 1:2 * lout:2])

    x = to_ncl(x_nlc) * to_ncl(mi_nlc)          # x.transpose(1,2) * mask_input
    y = jax.lax.conv_general_dilated(x, p['w1_torch'], (1,), 'VALID',
                                     dimension_numbers=dn) + p['b1'][None, :, None]
    y = pool(jnp.maximum(bn_train(y, p['g1'], p['be1']), 0.0)) * to_ncl(mc1_nlc)
    y = jax.lax.conv_general_dilated(y, p['w2_torch'], (1,), 'VALID',
                                     dimension_numbers=dn) + p['b2'][None, :, None]
    y = pool(jnp.maximum(bn_train(y, p['g2'], p['be2']), 0.0)) * to_ncl(mc2_nlc)
    flat = y.reshape(BATCH, -1)                 # torch x.view(B, -1): channel-major
    return flat @ p['wf_torch'].T + p['bf']


if __name__ == "__main__":
    key = jax.random.PRNGKey(0)
    k_param, k_x, k_mi, k_m1, k_m2 = jax.random.split(key, 5)
    params = init_params(k_param)

    # x is (batch, seq_len, 2) as fed to the PyTorch module (before its transpose)
    x = jax.random.normal(k_x, (BATCH, L0, CIN), jnp.float32)
    # masks supplied deterministically (NLC layout, matching the kernel layout)
    mask_input = jax.random.bernoulli(k_mi, 0.9, (BATCH, L0, CIN)).astype(jnp.float32)
    mask_conv1 = jax.random.bernoulli(k_m1, 0.5, (BATCH, L1P, C1)).astype(jnp.float32)
    mask_conv2 = jax.random.bernoulli(k_m2, 0.5, (BATCH, L2P, C2)).astype(jnp.float32)

    out, mi, m1, m2 = shared_net_forward(x, mask_input, mask_conv1, mask_conv2, params)
    out = jax.block_until_ready(out)

    ref = reference_forward(x, mask_input, mask_conv1, mask_conv2, params)
    if not jnp.allclose(out, ref, atol=1e-4, rtol=1e-4):
        raise AssertionError(
            f"kernel/reference mismatch, max err {float(jnp.max(jnp.abs(out - ref)))}")
    print("KERNEL_OK")
</pallas_src>

<mosaic_0001>
module attributes {stable_mosaic.version = 11 : i64} {
  func.func @shared_net_kernel(%arg0: memref<60x6xf32, #tpu.memory_space<vmem>>, %arg1: memref<60x6xf32, #tpu.memory_space<vmem>>, %arg2: memref<30x8xf32, #tpu.memory_space<vmem>>, %arg3: memref<12x16xf32, #tpu.memory_space<vmem>>, %arg4: memref<136x32xf32, #tpu.memory_space<vmem>>, %arg5: memref<2x32xf32, #tpu.memory_space<vmem>>) attributes {dimension_semantics = [], scalar_prefetch = 0 : i64, scratch_operands = 0 : i64, tpu.core_type = #tpu.core_type<tc>} {
    %c120 = arith.constant 120 : index
    %c0 = arith.constant 0 : index
    %0 = vector.load %arg4[%c120, %c0] : memref<136x32xf32, #tpu.memory_space<vmem>>, vector<6x8xf32>
    %c126 = arith.constant 126 : index
    %c0_0 = arith.constant 0 : index
    %1 = vector.load %arg4[%c126, %c0_0] : memref<136x32xf32, #tpu.memory_space<vmem>>, vector<1x8xf32>
    %c127 = arith.constant 127 : index
    %c0_1 = arith.constant 0 : index
    %2 = vector.load %arg4[%c127, %c0_1] : memref<136x32xf32, #tpu.memory_space<vmem>>, vector<1x8xf32>
    %c128 = arith.constant 128 : index
    %c0_2 = arith.constant 0 : index
    %3 = vector.load %arg4[%c128, %c0_2] : memref<136x32xf32, #tpu.memory_space<vmem>>, vector<1x8xf32>
    %c129 = arith.constant 129 : index
    %c0_3 = arith.constant 0 : index
    %4 = vector.load %arg4[%c129, %c0_3] : memref<136x32xf32, #tpu.memory_space<vmem>>, vector<1x16xf32>
    %c130 = arith.constant 130 : index
    %c0_4 = arith.constant 0 : index
    %5 = vector.load %arg4[%c130, %c0_4] : memref<136x32xf32, #tpu.memory_space<vmem>>, vector<1x16xf32>
    %c131 = arith.constant 131 : index
    %c0_5 = arith.constant 0 : index
    %6 = vector.load %arg4[%c131, %c0_5] : memref<136x32xf32, #tpu.memory_space<vmem>>, vector<1x16xf32>
    %c132 = arith.constant 132 : index
    %c0_6 = arith.constant 0 : index
    %7 = vector.load %arg4[%c132, %c0_6] : memref<136x32xf32, #tpu.memory_space<vmem>>, vector<1x32xf32>
    %c0_7 = arith.constant 0 : index
    %c0_8 = arith.constant 0 : index
    %8 = vector.load %arg0[%c0_7, %c0_8] : memref<60x6xf32, #tpu.memory_space<vmem>>, vector<60x6xf32>
    %c0_9 = arith.constant 0 : index
    %c0_10 = arith.constant 0 : index
    %9 = vector.load %arg1[%c0_9, %c0_10] : memref<60x6xf32, #tpu.memory_space<vmem>>, vector<60x6xf32>
    %10 = arith.mulf %8, %9 : vector<60x6xf32>
    %cst = arith.constant dense<0.000000e+00> : vector<60x8xf32>
    %11 = tpu.matmul %10, %0, %cst {dimension_numbers = #tpu.dot_dimension_numbers<[1], [0], [0], [1], [0, 0, 1, 1], [], []>} : vector<60x6xf32>, vector<6x8xf32>, vector<60x8xf32> -> vector<60x8xf32>
    %12 = vector.broadcast %1 : vector<1x8xf32> to vector<60x8xf32>
    %13 = arith.addf %11, %12 : vector<60x8xf32>
    %cst_11 = arith.constant dense<0.000000e+00> : vector<8xf32>
    %14 = vector.multi_reduction <add>, %13, %cst_11 [0] : vector<60x8xf32> to vector<8xf32>
    %15 = vector.shape_cast %14 : vector<8xf32> to vector<1x8xf32>
    %cst_12 = arith.constant 0.0166666675 : f32
    %16 = vector.broadcast %cst_12 : f32 to vector<1x8xf32>
    %17 = arith.mulf %15, %16 : vector<1x8xf32>
    %18 = arith.mulf %13, %13 : vector<60x8xf32>
    %cst_13 = arith.constant dense<0.000000e+00> : vector<8xf32>
    %19 = vector.multi_reduction <add>, %18, %cst_13 [0] : vector<60x8xf32> to vector<8xf32>
    %20 = vector.shape_cast %19 : vector<8xf32> to vector<1x8xf32>
    %cst_14 = arith.constant 0.0166666675 : f32
    %21 = vector.broadcast %cst_14 : f32 to vector<1x8xf32>
    %22 = arith.mulf %20, %21 : vector<1x8xf32>
    %23 = arith.mulf %17, %17 : vector<1x8xf32>
    %24 = arith.subf %22, %23 : vector<1x8xf32>
    %cst_15 = arith.constant 9.99999974E-6 : f32
    %25 = vector.broadcast %cst_15 : f32 to vector<1x8xf32>
    %26 = arith.addf %24, %25 : vector<1x8xf32>
    %27 = math.rsqrt %26 : vector<1x8xf32>
    %28 = arith.mulf %2, %27 : vector<1x8xf32>
    %29 = vector.broadcast %28 : vector<1x8xf32> to vector<60x8xf32>
    %30 = arith.mulf %13, %29 : vector<60x8xf32>
    %31 = arith.mulf %17, %28 : vector<1x8xf32>
    %32 = arith.subf %3, %31 : vector<1x8xf32>
    %33 = vector.broadcast %32 : vector<1x8xf32> to vector<60x8xf32>
    %34 = arith.addf %30, %33 : vector<60x8xf32>
    %cst_16 = arith.constant 0.000000e+00 : f32
    %35 = vector.broadcast %cst_16 : f32 to vector<60x8xf32>
    %36 = arith.maximumf %34, %35 : vector<60x8xf32>
    %37 = vector.extract_strided_slice %36 {offsets = [0, 0], sizes = [59, 8], strides = [1, 1]} : vector<60x8xf32> to vector<59x8xf32>
    %38 = vector.extract_strided_slice %36 {offsets = [1, 0], sizes = [59, 8], strides = [1, 1]} : vector<60x8xf32> to vector<59x8xf32>
    %39 = arith.maximumf %37, %38 : vector<59x8xf32>
    %40 = tpu.iota {dimensions = array<i32: 0>} : vector<30x59xi32>
    %41 = tpu.iota {dimensions = array<i32: 1>} : vector<30x59xi32>
    %c2_i32 = arith.constant 2 : i32
    %42 = vector.broadcast %c2_i32 : i32 to vector<30x59xi32>
    %43 = arith.muli %42, %40 : vector<30x59xi32>
    %44 = arith.cmpi eq, %41, %43 : vector<30x59xi32>
    %cst_17 = arith.constant 1.000000e+00 : f32
    %cst_18 = arith.constant 0.000000e+00 : f32
    %45 = vector.broadcast %cst_17 : f32 to vector<30x59xf32>
    %46 = vector.broadcast %cst_18 : f32 to vector<30x59xf32>
    %47 = arith.select %44, %45, %46 : vector<30x59xi1>, vector<30x59xf32>
    %cst_19 = arith.constant dense<0.000000e+00> : vector<30x8xf32>
    %48 = tpu.matmul %47, %39, %cst_19 {dimension_numbers = #tpu.dot_dimension_numbers<[1], [0], [0], [1], [0, 0, 1, 1], [], []>} : vector<30x59xf32>, vector<59x8xf32>, vector<30x8xf32> -> vector<30x8xf32>
    %c0_20 = arith.constant 0 : index
    %c0_21 = arith.constant 0 : index
    %49 = vector.load %arg2[%c0_20, %c0_21] : memref<30x8xf32, #tpu.memory_space<vmem>>, vector<30x8xf32>
    %50 = arith.mulf %48, %49 : vector<30x8xf32>
    %c96 = arith.constant 96 : index
    %c0_22 = arith.constant 0 : index
    %51 = vector.load %arg4[%c96, %c0_22] : memref<136x32xf32, #tpu.memory_space<vmem>>, vector<8x16xf32>
    %52 = vector.extract_strided_slice %50 {offsets = [0, 0], sizes = [28, 8], strides = [1, 1]} : vector<30x8xf32> to vector<28x8xf32>
    %cst_23 = arith.constant dense<0.000000e+00> : vector<28x16xf32>
    %53 = tpu.matmul %52, %51, %cst_23 {dimension_numbers = #tpu.dot_dimension_numbers<[1], [0], [0], [1], [0, 0, 1, 1], [], []>} : vector<28x8xf32>, vector<8x16xf32>, vector<28x16xf32> -> vector<28x16xf32>
    %54 = vector.broadcast %4 : vector<1x16xf32> to vector<28x16xf32>
    %55 = arith.addf %54, %53 : vector<28x16xf32>
    %c104 = arith.constant 104 : index
    %c0_24 = arith.constant 0 : index
    %56 = vector.load %arg4[%c104, %c0_24] : memref<136x32xf32, #tpu.memory_space<vmem>>, vector<8x16xf32>
    %57 = vector.extract_strided_slice %50 {offsets = [1, 0], sizes = [28, 8], strides = [1, 1]} : vector<30x8xf32> to vector<28x8xf32>
    %cst_25 = arith.constant dense<0.000000e+00> : vector<28x16xf32>
    %58 = tpu.matmul %57, %56, %cst_25 {dimension_numbers = #tpu.dot_dimension_numbers<[1], [0], [0], [1], [0, 0, 1, 1], [], []>} : vector<28x8xf32>, vector<8x16xf32>, vector<28x16xf32> -> vector<28x16xf32>
    %59 = arith.addf %55, %58 : vector<28x16xf32>
    %c112 = arith.constant 112 : index
    %c0_26 = arith.constant 0 : index
    %60 = vector.load %arg4[%c112, %c0_26] : memref<136x32xf32, #tpu.memory_space<vmem>>, vector<8x16xf32>
    %61 = vector.extract_strided_slice %50 {offsets = [2, 0], sizes = [28, 8], strides = [1, 1]} : vector<30x8xf32> to vector<28x8xf32>
    %cst_27 = arith.constant dense<0.000000e+00> : vector<28x16xf32>
    %62 = tpu.matmul %61, %60, %cst_27 {dimension_numbers = #tpu.dot_dimension_numbers<[1], [0], [0], [1], [0, 0, 1, 1], [], []>} : vector<28x8xf32>, vector<8x16xf32>, vector<28x16xf32> -> vector<28x16xf32>
    %63 = arith.addf %59, %62 : vector<28x16xf32>
    %64 = tpu.iota {dimensions = array<i32: 0>} : vector<28x16xi32>
    %c13_i32 = arith.constant 13 : i32
    %65 = vector.broadcast %c13_i32 : i32 to vector<28x16xi32>
    %66 = arith.cmpi slt, %64, %65 : vector<28x16xi32>
    %c15_i32 = arith.constant 15 : i32
    %67 = vector.broadcast %c15_i32 : i32 to vector<28x16xi32>
    %68 = arith.cmpi sge, %64, %67 : vector<28x16xi32>
    %69 = arith.ori %66, %68 : vector<28x16xi1>
    %cst_28 = arith.constant 1.000000e+00 : f32
    %cst_29 = arith.constant 0.000000e+00 : f32
    %70 = vector.broadcast %cst_28 : f32 to vector<28x16xf32>
    %71 = vector.broadcast %cst_29 : f32 to vector<28x16xf32>
    %72 = arith.select %69, %70, %71 : vector<28x16xi1>, vector<28x16xf32>
    %73 = arith.mulf %63, %72 : vector<28x16xf32>
    %cst_30 = arith.constant dense<0.000000e+00> : vector<16xf32>
    %74 = vector.multi_reduction <add>, %73, %cst_30 [0] : vector<28x16xf32> to vector<16xf32>
    %75 = vector.shape_cast %74 : vector<16xf32> to vector<1x16xf32>
    %cst_31 = arith.constant 0.0384615399 : f32
    %76 = vector.broadcast %cst_31 : f32 to vector<1x16xf32>
    %77 = arith.mulf %75, %76 : vector<1x16xf32>
    %78 = arith.mulf %73, %73 : vector<28x16xf32>
    %cst_32 = arith.constant dense<0.000000e+00> : vector<16xf32>
    %79 = vector.multi_reduction <add>, %78, %cst_32 [0] : vector<28x16xf32> to vector<16xf32>
    %80 = vector.shape_cast %79 : vector<16xf32> to vector<1x16xf32>
    %cst_33 = arith.constant 0.0384615399 : f32
    %81 = vector.broadcast %cst_33 : f32 to vector<1x16xf32>
    %82 = arith.mulf %80, %81 : vector<1x16xf32>
    %83 = arith.mulf %77, %77 : vector<1x16xf32>
    %84 = arith.subf %82, %83 : vector<1x16xf32>
    %cst_34 = arith.constant 9.99999974E-6 : f32
    %85 = vector.broadcast %cst_34 : f32 to vector<1x16xf32>
    %86 = arith.addf %84, %85 : vector<1x16xf32>
    %87 = math.rsqrt %86 : vector<1x16xf32>
    %88 = arith.mulf %5, %87 : vector<1x16xf32>
    %89 = vector.broadcast %88 : vector<1x16xf32> to vector<28x16xf32>
    %90 = arith.mulf %63, %89 : vector<28x16xf32>
    %91 = arith.mulf %77, %88 : vector<1x16xf32>
    %92 = arith.subf %6, %91 : vector<1x16xf32>
    %93 = vector.broadcast %92 : vector<1x16xf32> to vector<28x16xf32>
    %94 = arith.addf %90, %93 : vector<28x16xf32>
    %cst_35 = arith.constant 0.000000e+00 : f32
    %95 = vector.broadcast %cst_35 : f32 to vector<28x16xf32>
    %96 = arith.maximumf %94, %95 : vector<28x16xf32>
    %97 = vector.extract_strided_slice %96 {offsets = [0, 0], sizes = [27, 16], strides = [1, 1]} : vector<28x16xf32> to vector<27x16xf32>
    %98 = vector.extract_strided_slice %96 {offsets = [1, 0], sizes = [27, 16], strides = [1, 1]} : vector<28x16xf32> to vector<27x16xf32>
    %99 = arith.maximumf %97, %98 : vector<27x16xf32>
    %100 = tpu.iota {dimensions = array<i32: 0>} : vector<12x27xi32>
    %101 = tpu.iota {dimensions = array<i32: 1>} : vector<12x27xi32>
    %c1_i32 = arith.constant 1 : i32
    %102 = vector.broadcast %c1_i32 : i32 to vector<12x27xi32>
    %103 = arith.andi %100, %102 : vector<12x27xi32>
    %c14_i32 = arith.constant 14 : i32
    %104 = vector.broadcast %c14_i32 : i32 to vector<12x27xi32>
    %105 = arith.muli %104, %103 : vector<12x27xi32>
    %106 = arith.addi %100, %105 : vector<12x27xi32>
    %107 = arith.cmpi eq, %101, %106 : vector<12x27xi32>
    %cst_36 = arith.constant 1.000000e+00 : f32
    %cst_37 = arith.constant 0.000000e+00 : f32
    %108 = vector.broadcast %cst_36 : f32 to vector<12x27xf32>
    %109 = vector.broadcast %cst_37 : f32 to vector<12x27xf32>
    %110 = arith.select %107, %108, %109 : vector<12x27xi1>, vector<12x27xf32>
    %cst_38 = arith.constant dense<0.000000e+00> : vector<12x16xf32>
    %111 = tpu.matmul %110, %99, %cst_38 {dimension_numbers = #tpu.dot_dimension_numbers<[1], [0], [0], [1], [0, 0, 1, 1], [], []>} : vector<12x27xf32>, vector<27x16xf32>, vector<12x16xf32> -> vector<12x16xf32>
    %c0_39 = arith.constant 0 : index
    %c0_40 = arith.constant 0 : index
    %112 = vector.load %arg3[%c0_39, %c0_40] : memref<12x16xf32, #tpu.memory_space<vmem>>, vector<12x16xf32>
    %113 = arith.mulf %111, %112 : vector<12x16xf32>
    %c0_41 = arith.constant 0 : index
    %c0_42 = arith.constant 0 : index
    %114 = vector.load %arg4[%c0_41, %c0_42] : memref<136x32xf32, #tpu.memory_space<vmem>>, vector<16x32xf32>
    %115 = vector.extract_strided_slice %113 {offsets = [0, 0], sizes = [2, 16], strides = [1, 1]} : vector<12x16xf32> to vector<2x16xf32>
    %cst_43 = arith.constant dense<0.000000e+00> : vector<2x32xf32>
    %116 = tpu.matmul %115, %114, %cst_43 {dimension_numbers = #tpu.dot_dimension_numbers<[1], [0], [0], [1], [0, 0, 1, 1], [], []>} : vector<2x16xf32>, vector<16x32xf32>, vector<2x32xf32> -> vector<2x32xf32>
    %117 = vector.broadcast %7 : vector<1x32xf32> to vector<2x32xf32>
    %118 = arith.addf %117, %116 : vector<2x32xf32>
    %c16 = arith.constant 16 : index
    %c0_44 = arith.constant 0 : index
    %119 = vector.load %arg4[%c16, %c0_44] : memref<136x32xf32, #tpu.memory_space<vmem>>, vector<16x32xf32>
    %120 = vector.extract_strided_slice %113 {offsets = [2, 0], sizes = [2, 16], strides = [1, 1]} : vector<12x16xf32> to vector<2x16xf32>
    %cst_45 = arith.constant dense<0.000000e+00> : vector<2x32xf32>
    %121 = tpu.matmul %120, %119, %cst_45 {dimension_numbers = #tpu.dot_dimension_numbers<[1], [0], [0], [1], [0, 0, 1, 1], [], []>} : vector<2x16xf32>, vector<16x32xf32>, vector<2x32xf32> -> vector<2x32xf32>
    %122 = arith.addf %118, %121 : vector<2x32xf32>
    %c32 = arith.constant 32 : index
    %c0_46 = arith.constant 0 : index
    %123 = vector.load %arg4[%c32, %c0_46] : memref<136x32xf32, #tpu.memory_space<vmem>>, vector<16x32xf32>
    %124 = vector.extract_strided_slice %113 {offsets = [4, 0], sizes = [2, 16], strides = [1, 1]} : vector<12x16xf32> to vector<2x16xf32>
    %cst_47 = arith.constant dense<0.000000e+00> : vector<2x32xf32>
    %125 = tpu.matmul %124, %123, %cst_47 {dimension_numbers = #tpu.dot_dimension_numbers<[1], [0], [0], [1], [0, 0, 1, 1], [], []>} : vector<2x16xf32>, vector<16x32xf32>, vector<2x32xf32> -> vector<2x32xf32>
    %126 = arith.addf %122, %125 : vector<2x32xf32>
    %c48 = arith.constant 48 : index
    %c0_48 = arith.constant 0 : index
    %127 = vector.load %arg4[%c48, %c0_48] : memref<136x32xf32, #tpu.memory_space<vmem>>, vector<16x32xf32>
    %128 = vector.extract_strided_slice %113 {offsets = [6, 0], sizes = [2, 16], strides = [1, 1]} : vector<12x16xf32> to vector<2x16xf32>
    %cst_49 = arith.constant dense<0.000000e+00> : vector<2x32xf32>
    %129 = tpu.matmul %128, %127, %cst_49 {dimension_numbers = #tpu.dot_dimension_numbers<[1], [0], [0], [1], [0, 0, 1, 1], [], []>} : vector<2x16xf32>, vector<16x32xf32>, vector<2x32xf32> -> vector<2x32xf32>
    %130 = arith.addf %126, %129 : vector<2x32xf32>
    %c64 = arith.constant 64 : index
    %c0_50 = arith.constant 0 : index
    %131 = vector.load %arg4[%c64, %c0_50] : memref<136x32xf32, #tpu.memory_space<vmem>>, vector<16x32xf32>
    %132 = vector.extract_strided_slice %113 {offsets = [8, 0], sizes = [2, 16], strides = [1, 1]} : vector<12x16xf32> to vector<2x16xf32>
    %cst_51 = arith.constant dense<0.000000e+00> : vector<2x32xf32>
    %133 = tpu.matmul %132, %131, %cst_51 {dimension_numbers = #tpu.dot_dimension_numbers<[1], [0], [0], [1], [0, 0, 1, 1], [], []>} : vector<2x16xf32>, vector<16x32xf32>, vector<2x32xf32> -> vector<2x32xf32>
    %134 = arith.addf %130, %133 : vector<2x32xf32>
    %c80 = arith.constant 80 : index
    %c0_52 = arith.constant 0 : index
    %135 = vector.load %arg4[%c80, %c0_52] : memref<136x32xf32, #tpu.memory_space<vmem>>, vector<16x32xf32>
    %136 = vector.extract_strided_slice %113 {offsets = [10, 0], sizes = [2, 16], strides = [1, 1]} : vector<12x16xf32> to vector<2x16xf32>
    %cst_53 = arith.constant dense<0.000000e+00> : vector<2x32xf32>
    %137 = tpu.matmul %136, %135, %cst_53 {dimension_numbers = #tpu.dot_dimension_numbers<[1], [0], [0], [1], [0, 0, 1, 1], [], []>} : vector<2x16xf32>, vector<16x32xf32>, vector<2x32xf32> -> vector<2x32xf32>
    %138 = arith.addf %134, %137 : vector<2x32xf32>
    %c0_54 = arith.constant 0 : index
    %c0_55 = arith.constant 0 : index
    %139 = vector.load %arg5[%c0_54, %c0_55] : memref<2x32xf32, #tpu.memory_space<vmem>>, vector<2x32xf32>
    tpu.vector_store %arg5[%c0_54, %c0_55], %138 {strides = array<i32>} : memref<2x32xf32, #tpu.memory_space<vmem>>, vector<2x32xf32>,
    return
  }
}

</mosaic_0001>

<bundles_post_ra>
// kernel: tpu_custom_call.1
= control target key start
LH: loop header
LB: loop body
LE: loop exit
PB: predicated region body
PF: predicated region fallthrough
CT: control target
= control target key end

     0   :  { %vm82_vm0 = vcmask 1045504   ;;  %vm57_vm1 = vcmask 48128   ;;  %s2020_s0 = inlined_call_operand.vmem [shape: f32[60,6], index: 0, kind: input, shape index: {}]   ;;  %s2021_s1 = inlined_call_operand.vmem [shape: f32[60,6], index: 1, kind: input, shape index: {}]   ;;  %s2022_s2 = inlined_call_operand.vmem [shape: f32[30,8], index: 2, kind: input, shape index: {}]   ;;  %s2023_s3 = inlined_call_operand.vmem [shape: f32[12,16], index: 3, kind: input, shape index: {}]   ;;  %s2024_s4 = inlined_call_operand.vmem [shape: f32[136,32], index: 4, kind: input, shape index: {}]   ;;  %s2025_s5 = inlined_call_operand.hbm [shape: f32[2,32], index: 5, kind: output, shape index: {}]  }
   0x1   :  { %v21_v0 = vld [vmem:[%s2024_s4 + $0x78] sm:$0x3f]  ;;  %v29_v1 = vld [vmem:[%s2020_s0] sm:$0xff]  ;;  %v30_v4 = vld [vmem:[%s2020_s0 + $0x8] sm:$0xff] }
   0x2   :  { %v37_v2 = vld [vmem:[%s2021_s1] sm:$0xff]  ;;  %1542 = vmatprep.subr.msk.mxu0 %vm82_vm0, %v21_v0  ;;  %v38_v5 = vld [vmem:[%s2021_s1 + $0x8] sm:$0xff]  ;;  %v31_v6 = vld [vmem:[%s2020_s0 + $0x10] sm:$0xff] }
   0x3   :  { %v45_v3 = vmul.f32 %v37_v2, %v29_v1  ;;  %1543 = vmatpush3.msk.msra.mxu0 %vm82_vm0, %v21_v0  ;;  %v46_v7 = vmul.f32 %v38_v5, %v30_v4  ;;  %v39_v8 = vld [vmem:[%s2021_s1 + $0x10] sm:$0xff]  ;;  %v32_v9 = vld [vmem:[%s2020_s0 + $0x18] sm:$0xff]  ;;  %v33_v12 = vld [vmem:[%s2020_s0 + $0x20] sm:$0xff] }
   0x4   :  { %v40_v10 = vld [vmem:[%s2021_s1 + $0x18] sm:$0xff]  ;;  %v47_v11 = vmul.f32 %v39_v8, %v31_v6  ;;  %v41_v13 = vld [vmem:[%s2021_s1 + $0x20] sm:$0xff]  ;;  %v34_v16 = vld [vmem:[%s2020_s0 + $0x28] sm:$0xff] }
   0x5   :  { %1544 = vmatprep.mubr.msk.f32.mxu0 %vm57_vm1, %v45_v3  ;;  %v48_v14 = vmul.f32 %v40_v10, %v32_v9  ;;  %v49_v15 = vmul.f32 %v41_v13, %v33_v12  ;;  %v42_v17 = vld [vmem:[%s2021_s1 + $0x28] sm:$0xff] }
   0x6   :  { %1545 = vmatmul.mubr.msk.f32.vlgmr.msra.gmra.mxu0 %vm57_vm1, %v46_v7 }
   0x7   :  { %1547 = vmatprep.mubr.msk.f32.mxu0 %vm57_vm1, %v47_v11 }
   0x8   :  { %10 = vsyncpa [#allocation3], 0  ;;  %v35_v18 = vld [vmem:[%s2020_s0 + $0x30] sm:$0xff]  ;;  %v50_v20 = vmul.f32 %v42_v17, %v34_v16  ;;  %v36_v22 = vld [vmem:[%s2020_s0 + $0x38] sm:$0xf]  ;;  %v250_v25 = vlaneseq  ;;  %vm343_vm3 = vcmask 482304  }
   0x9   :  { %v43_v19 = vld [vmem:[%s2021_s1 + $0x30] sm:$0xff]  ;;  %v44_v23 = vld [vmem:[%s2021_s1 + $0x38] sm:$0xf]  ;;  %v1684_v29 = vmov 0.0   ;;  %v453_v31 = vld [vmem:[%s2024_s4 + $0x60] sm:$0xff]  ;;  %vm191_vm4 = vcmask 64512  }
   0xa   :  { %1548 = vmatmul.mubr.msk.f32.gmra.mxu0 %vm57_vm1, %v48_v14  ;;  %v51_v21 = vmul.f32 %v43_v19, %v35_v18  ;;  %v52_v24 = vmul.f32 %v44_v23, %v36_v22  ;;  %v1778_v26 = vshrl.u32 %v250_v25, 7  ;;  %v1780_v27 = vand.u32 127, %v250_v25  ;;  %1578 = vmatprep.subr.mxu0 %v453_v31  ;;  %v1444_v32 = vld [vmem:[%s2024_s4 + $0x7e] ss:$0 sm:$0xff]  ;;  %s1686_s26 = smov [#allocation2]  }
   0xb   :  { %1550 = vmatprep.mubr.msk.f32.mxu0 %vm57_vm1, %v49_v15  ;;  %1579 = vmatpush3.msra.mxu0 %v453_v31  ;;  %vm205_vm5 = vcmask 60416   ;;  %vm292_vm6 = vcmask 1046528   ;;  %vm356_vm7 = vcmask 1042432   ;;  %vm879_vm12 = vcmask 220160   ;;  %s1436_s0 = sshll.u32 %s1686_s26, 4  ;;  %s1437_s0 = int_to_ptr.vmem [resolvable:$true] %s1436_s0 }
   0xc   :  { %v331_v28 = vmul.u32 2, %v1778_v26  ;;  %p1667_p1 = scmp.lt.s32.totalorder %s1437_s0, %s1437_s0 }
   0xe   :  { %1551 = vmatmul.mubr.msk.f32.gmra.mxu0 %vm57_vm1, %v50_v20  ;;  %vm335_vm2 = vcmp.eq.s32.totalorder %v1780_v27, %v331_v28 }
   0xf   :  { %1553 = vmatprep.mubr.msk.f32.mxu0 %vm57_vm1, %v51_v21  ;;  %v339_v30 = vsel %vm335_vm2, 1.0, %v1684_v29 }
  0x10   :  { %1572 = vmatprep.mubr.msk.f32.mxu1 %vm343_vm3, %v339_v30 }
  0x12   :  { %1554 = vmatmul.mubr.msk.f32.gmra.mxu0 %vm57_vm1, %v52_v24  ;;  %vm795_vm1 = vcmask 125952  }
  0xc6   :  { %v1546_v33 = vpop.f32.mrf.mxu0 }
  0xc7   :  { %v1792_v34 = vadd.f32 %v1546_v33, %v1444_v32 }
  0xc8   :  { %v152_v35 = vpop.f32.mrf.mxu0 }
  0xc9   :  { %v1794_v36 = vadd.f32 %v1444_v32, %v152_v35  ;;  %v216_v38 = vmul.f32 %v1792_v34, %v1792_v34  ;;  %v193_v43 = vsel %vm191_vm4, %v1792_v34, 0.0 }
  0xca   :  { %v1549_v37 = vpop.f32.mrf.mxu0 }
  0xcb   :  { %v192_v39 = vsel %vm191_vm4, %v1794_v36, 0.0  ;;  %v215_v40 = vmul.f32 %v1794_v36, %v1794_v36  ;;  %v1802_v41 = vadd.f32 %v1549_v37, %v1444_v32  ;;  %v224_v49 = vsel %vm191_vm4, %v216_v38, 0.0 }
  0xcc   :  { %v162_v42 = vpop.f32.mrf.mxu0  ;;  %v194_v46 = vadd.f32 %v193_v43, %v192_v39 }
  0xcd   :  { %v223_v44 = vsel %vm191_vm4, %v215_v40, 0.0  ;;  %v1807_v45 = vadd.f32 %v1444_v32, %v162_v42  ;;  %v218_v47 = vmul.f32 %v1802_v41, %v1802_v41  ;;  %v197_v56 = vsel %vm191_vm4, %v1802_v41, 0.0 }
  0xce   :  { %v1552_v48 = vpop.f32.mrf.mxu0  ;;  %v225_v53 = vadd.f32 %v224_v49, %v223_v44 }
  0xcf   :  { %v195_v50 = vsel %vm191_vm4, %v1807_v45, 0.0  ;;  %v217_v51 = vmul.f32 %v1807_v45, %v1807_v45  ;;  %v1816_v52 = vadd.f32 %v1552_v48, %v1444_v32  ;;  %v228_v59 = vsel %vm191_vm4, %v218_v47, 0.0  ;;  %v23_v47 = vld [vmem:[%s2024_s4 + $0x7f] sm:$0x1] }
  0xd0   :  { %v196_v54 = vadd.f32 %v195_v50, %v194_v46  ;;  %v172_v55 = vpop.f32.mrf.mxu0  ;;  %v1835_v48 = vsub.s32 0, %v1778_v26 }
  0xd1   :  { %v226_v57 = vsel %vm191_vm4, %v217_v51, 0.0  ;;  %v173_v58 = vadd.f32 %v1444_v32, %v172_v55  ;;  %v220_v63 = vmul.f32 %v1816_v52, %v1816_v52  ;;  %v201_v6 = vsel %vm191_vm4, %v1816_v52, 0.0  ;;  %v24_v51 = vld [vmem:[%s2024_s4 + $0x80] sm:$0x1] }
  0xd2   :  { %v227_v60 = vadd.f32 %v226_v57, %v225_v53  ;;  %v198_v61 = vadd.f32 %v197_v56, %v196_v54  ;;  %v1555_v62 = vpop.f32.mrf.mxu0 }
  0xd3   :  { %v199_v0 = vsel %vm191_vm4, %v173_v58, 0.0  ;;  %v219_v1 = vmul.f32 %v173_v58, %v173_v58  ;;  %v188_v2 = vadd.f32 %v1555_v62, %v1444_v32  ;;  %v232_v11 = vsel %vm191_vm4, %v220_v63, 0.0 }
  0xd4   :  { %v200_v3 = vadd.f32 %v199_v0, %v198_v61  ;;  %v229_v4 = vadd.f32 %v228_v59, %v227_v60  ;;  %v182_v5 = vpop.f32.mrf.mxu0 }
  0xd5   :  { %v230_v7 = vsel %vm191_vm4, %v219_v1, 0.0  ;;  %v183_v8 = vadd.f32 %v1444_v32, %v182_v5  ;;  %v222_v12 = vmul.f32 %v188_v2, %v188_v2  ;;  %v206_v17 = vsel %vm205_vm5, %v188_v2, 0.0 }
  0xd6   :  { %v231_v9 = vadd.f32 %v230_v7, %v229_v4  ;;  %v202_v10 = vadd.f32 %v201_v6, %v200_v3 }
  0xd7   :  { %v203_v13 = vsel %vm191_vm4, %v183_v8, 0.0  ;;  %v221_v14 = vmul.f32 %v183_v8, %v183_v8  ;;  %v236_v21 = vsel %vm205_vm5, %v222_v12, 0.0 }
  0xd8   :  { %v204_v15 = vadd.f32 %v203_v13, %v202_v10  ;;  %v233_v16 = vadd.f32 %v232_v11, %v231_v9 }
  0xd9   :  { %v234_v18 = vsel %vm191_vm4, %v221_v14, 0.0 }
  0xda   :  { %v207_v19 = vadd.f32 %v206_v17, %v204_v15  ;;  %v235_v20 = vadd.f32 %v234_v18, %v233_v16 }
  0xdc   :  { %v208_v22 = vrot.slane %v207_v19, 4  ;;  %v237_v23 = vadd.f32 %v236_v21, %v235_v20 }
  0xde   :  { %v209_v24 = vadd.f32 %v208_v22, %v207_v19  ;;  %v238_v25 = vrot.slane %v237_v23, 4 }
  0xe0   :  { %v210_v28 = vrot.slane %v209_v24, 2  ;;  %v239_v30 = vadd.f32 %v238_v25, %v237_v23 }
  0xe2   :  { %v211_v31 = vadd.f32 %v210_v28, %v209_v24  ;;  %v240_v32 = vrot.slane %v239_v30, 2 }
  0xe4   :  { %v212_v33 = vrot.slane %v211_v31, 1  ;;  %v241_v35 = vadd.f32 %v240_v32, %v239_v30 }
  0xe6   :  { %v213_v37 = vadd.f32 %v212_v33, %v211_v31  ;;  %v242_v38 = vrot.slane %v241_v35, 1  ;;  %v1854_v31 = vadd.s32 8, %v1778_v26  ;;  %v327_v33 = vadd.s32 16, %v1778_v26 }
  0xe8   :  { %v214_v39 = vmul.f32 0.016666668, %v213_v37  ;;  %v243_v40 = vadd.f32 %v242_v38, %v241_v35  ;;  %vm770_vm13 = vcmp.lt.s32.totalorder %v1854_v31, 13  ;;  %vm774_vm14 = vcmp.ge.s32.totalorder %v1854_v31, 15 }
  0xe9   :  { %vm778_vm15 = vmor %vm770_vm13, %vm774_vm14 }
  0xea   :  { %v244_v42 = vmul.f32 0.016666668, %v243_v40  ;;  %v245_v43 = vmul.f32 %v214_v39, %v214_v39  ;;  %v328_v40 = vadd.s32 24, %v1778_v26 }
  0xec   :  { %v246_v44 = vsub.f32 %v244_v42, %v245_v43  ;;  %v333_v43 = vmul.u32 2, %v327_v33 }
  0xee   :  { %v247_v46 = vadd.f32 1e-05, %v246_v44  ;;  %vm337_vm9 = vcmp.eq.s32.totalorder %v1780_v27, %v333_v43 }
  0xf0   :  { %1658 = vrsqrt.f32 %v247_v46 }
  0xfd   :  { %v1659_v49 = vpop.eup %1658 }
  0xfe   :  { %v249_v50 = vmul.f32 %v1659_v49, %v23_v47  ;;  %v334_v47 = vmul.u32 2, %v328_v40 }
 0x100   :  { %v253_v53 = vrot.slane %v249_v50, %v1835_v48  ;;  %v262_v54 = vmul.f32 %v249_v50, %v214_v39  ;;  %v332_v39 = vmul.u32 2, %v1854_v31  ;;  %v341_v50 = vsel %vm337_vm9, 1.0, %v1684_v29 }
 0x101   :  { %vm338_vm10 = vcmp.eq.s32.totalorder %v1780_v27, %v334_v47 }
 0x102   :  { %v263_v55 = vsub.f32 %v24_v51, %v262_v54  ;;  %v260_v56 = vmul.f32 %v253_v53, %v183_v8  ;;  %v261_v59 = vmul.f32 %v253_v53, %v188_v2  ;;  %v259_v60 = vmul.f32 %v253_v53, %v1816_v52  ;;  %v664_v54 = vld [vmem:[%s2024_s4 + $0x70] sm:$0xff] }
 0x103   :  { %v258_v61 = vmul.f32 %v253_v53, %v173_v58  ;;  %v257_v62 = vmul.f32 %v253_v53, %v1802_v41  ;;  %v256_v63 = vmul.f32 %v253_v53, %v1807_v45  ;;  %v255_v0 = vmul.f32 %v253_v53, %v1792_v34  ;;  %1594 = vmatprep.subr.mxu0 %v664_v54 }
 0x104   :  { %v267_v57 = vrot.slane %v263_v55, %v1835_v48  ;;  %v254_v1 = vmul.f32 %v253_v53, %v1794_v36  ;;  %vm336_vm8 = vcmp.eq.s32.totalorder %v1780_v27, %v332_v39  ;;  %v342_v51 = vsel %vm338_vm10, 1.0, %v1684_v29  ;;  %v559_v53 = vld [vmem:[%s2024_s4 + $0x68] sm:$0xff] }
 0x105   :  { %v340_v49 = vsel %vm336_vm8, 1.0, %v1684_v29  ;;  %v446_v55 = vld [vmem:[%s2022_s2 + $0x8] sm:$0xff] }
 0x106   :  { %v275_v3 = vadd.f32 %v267_v57, %v261_v59  ;;  %v274_v4 = vadd.f32 %v267_v57, %v260_v56  ;;  %v273_v5 = vadd.f32 %v267_v57, %v259_v60  ;;  %v272_v6 = vadd.f32 %v267_v57, %v258_v61  ;;  %v448_v61 = vld [vmem:[%s2022_s2 + $0x18] sm:$0x3f] }
 0x107   :  { %v271_v7 = vadd.f32 %v267_v57, %v257_v62  ;;  %v270_v8 = vadd.f32 %v267_v57, %v256_v63  ;;  %v269_v9 = vadd.f32 %v267_v57, %v255_v0  ;;  %v268_v10 = vadd.f32 %v267_v57, %v254_v1  ;;  %v445_v57 = vld [vmem:[%s2022_s2] sm:$0xff]  ;;  %v447_v0 = vld [vmem:[%s2022_s2 + $0x10] sm:$0xff] }
 0x108   :  { %v283_v2 = vmax.f32 %v275_v3, 0.0  ;;  %v282_v11 = vmax.f32 %v274_v4, 0.0  ;;  %v281_v52 = vmax.f32 %v273_v5, 0.0  ;;  %v280_v58 = vmax.f32 %v272_v6, 0.0 }
 0x109   :  { %v279_v41 = vmax.f32 %v271_v7, 0.0  ;;  %v277_v12 = vmax.f32 %v269_v9, 0.0  ;;  %v276_v45 = vmax.f32 %v268_v10, 0.0  ;;  %v278_v15 = vmax.f32 %v270_v8, 0.0 }
 0x10a   :  { %v306_v13 = vrot.slane %v283_v2, 1  ;;  %v304_v34 = vrot.slane %v282_v11, 1  ;;  %v302_v36 = vrot.slane %v281_v52, 1  ;;  %v300_v14 = vrot.slane %v280_v58, 1 }
 0x10b   :  { %v294_v16 = vrot.slane %v277_v12, 1  ;;  %v293_v17 = vrot.slane %v276_v45, 1  ;;  %v298_v22 = vrot.slane %v279_v41, 1  ;;  %v296_v25 = vrot.slane %v278_v15, 1 }
 0x10c   :  { %v323_v18 = vmax.f32 %v283_v2, %v306_v13  ;;  %v307_v19 = vsel %vm292_vm6, %v304_v34, %v306_v13  ;;  %v305_v21 = vsel %vm292_vm6, %v302_v36, %v304_v34  ;;  %v303_v24 = vsel %vm292_vm6, %v300_v14, %v302_v36 }
 0x10d   :  { %v322_v20 = vmax.f32 %v282_v11, %v307_v19  ;;  %v295_v23 = vsel %vm292_vm6, %v293_v17, %v294_v16  ;;  %v321_v30 = vmax.f32 %v281_v52, %v305_v21  ;;  %v301_v32 = vsel %vm292_vm6, %v298_v22, %v300_v14 }
 0x10e   :  { %1556 = vmatprep.subr.msk.mxu1 %vm356_vm7, %v323_v18  ;;  %v316_v28 = vmax.f32 %v276_v45, %v295_v23  ;;  %v320_v35 = vmax.f32 %v280_v58, %v303_v24  ;;  %v299_v37 = vsel %vm292_vm6, %v296_v25, %v298_v22  ;;  %v319_v38 = vmax.f32 %v279_v41, %v301_v32 }
 0x10f   :  { %1557 = vmatpush3.msk.msra.mxu1 %vm356_vm7, %v323_v18  ;;  %v297_v42 = vsel %vm292_vm6, %v294_v16, %v296_v25  ;;  %v318_v44 = vmax.f32 %v278_v15, %v299_v37  ;;  %v869_v34 = vand.u32 1, %v1778_v26  ;;  %v969_v16 = vld [vmem:[%s2024_s4 + $0x8] sm:$0xff]  ;;  %v1463_v18 = vld [vmem:[%s2024_s4 + $0x81] ss:$0 sm:$0xff] }
 0x110   :  { %1558 = vmatprep.subr.mxu1 %v322_v20  ;;  %v317_v46 = vmax.f32 %v277_v12, %v297_v42 }
 0x111   :  { %1559 = vmatpush3.msra.mxu1 %v322_v20  ;;  %v871_v36 = vmul.u32 14, %v869_v34 }
 0x112   :  { %1560 = vmatprep.subr.mxu1 %v321_v30 }
 0x113   :  { %1561 = vmatpush3.msra.mxu1 %v321_v30  ;;  %v873_v14 = vadd.s32 %v871_v36, %v1778_v26  ;;  %v782_v30 = vsel %vm778_vm15, 1.0, %v1684_v29 }
 0x114   :  { %1562 = vmatprep.subr.mxu1 %v320_v35 }
 0x115   :  { %1563 = vmatpush3.msra.mxu1 %v320_v35  ;;  %vm875_vm11 = vcmp.eq.s32.totalorder %v1780_v27, %v873_v14 }
 0x116   :  { %1564 = vmatprep.subr.mxu1 %v319_v38  ;;  %v877_v15 = vsel %vm875_vm11, 1.0, %v1684_v29 }
 0x117   :  { %1565 = vmatpush3.msra.mxu1 %v319_v38 }
 0x118   :  { %1566 = vmatprep.subr.mxu1 %v318_v44 }
 0x119   :  { %1567 = vmatpush3.msra.mxu1 %v318_v44 }
 0x11a   :  { %1568 = vmatprep.subr.mxu1 %v317_v46 }
 0x11b   :  { %1569 = vmatpush3.msra.mxu1 %v317_v46 }
 0x11c   :  { %1570 = vmatprep.subr.mxu1 %v316_v28 }
 0x11d   :  { %1571 = vmatpush3.msra.mxu1 %v316_v28 }
 0x11e   :  { %1573 = vmatmul.mubr.msk.f32.vlgmr.msra.gmra.mxu1 %vm343_vm3, %v340_v49  ;;  %1586 = vmatprep.subr.mxu1 %v559_v53 }
 0x11f   :  { %1575 = vmatprep.mubr.msk.f32.mxu1 %vm343_vm3, %v341_v50  ;;  %1587 = vmatpush3.msra.mxu1 %v559_v53 }
 0x122   :  { %1576 = vmatmul.mubr.msk.f32.gmra.mxu1 %vm343_vm3, %v342_v51  ;;  %vm1685_vm3 = vmmov 0  }
 0x1de   :  { %v1574_v56 = vpop.f32.mrf.mxu1 }
 0x1df   :  { %v450_v59 = vmul.f32 %v1574_v56, %v446_v55 }
 0x1e0   :  { %v426_v60 = vpop.f32.mrf.mxu1 }
 0x1e1   :  { %v449_v62 = vmul.f32 %v445_v57, %v426_v60  ;;  %v561_v1 = vrot.slane %v450_v59, 1  ;;  %v666_v9 = vrot.slane %v450_v59, 2 }
 0x1e2   :  { %v1577_v63 = vpop.f32.mrf.mxu1 }
 0x1e3   :  { %v560_v3 = vrot.slane %v449_v62, 1  ;;  %v452_v4 = vmul.f32 %v1577_v63, %v448_v61  ;;  %1580 = vmatprep.mubr.msk.f32.mxu0 %vm191_vm4, %v449_v62  ;;  %v665_v5 = vrot.slane %v449_v62, 2 }
 0x1e4   :  { %v436_v6 = vpop.f32.mrf.mxu1  ;;  %1581 = vmatmul.mubr.msk.f32.vlgmr.msra.gmra.mxu0 %vm191_vm4, %v450_v59 }
 0x1e5   :  { %v451_v7 = vmul.f32 %v447_v0, %v436_v6  ;;  %1595 = vmatpush3.msra.mxu0 %v664_v54  ;;  %v562_v8 = vsel %vm292_vm6, %v560_v3, %v561_v1  ;;  %v565_v10 = vrot.slane %v452_v4, 1  ;;  %v667_v52 = vsel %vm82_vm0, %v665_v5, %v666_v9 }
 0x1e6   :  { %1588 = vmatprep.mubr.msk.f32.mxu1 %vm191_vm4, %v562_v8  ;;  %1613 = vmatprep.subr.mxu0 %v1684_v29  ;;  %v670_v12 = vrot.slane %v452_v4, 2 }
 0x1e7   :  { %v563_v2 = vrot.slane %v451_v7, 1  ;;  %v668_v11 = vrot.slane %v451_v7, 2  ;;  %1583 = vmatprep.mubr.msk.f32.mxu0 %vm191_vm4, %v451_v7 }
 0x1e8   :  { %1584 = vmatmul.mubr.msk.f32.gmra.mxu0 %vm191_vm4, %v452_v4 }
 0x1e9   :  { %1596 = vmatprep.mubr.msk.f32.mxu0 %vm191_vm4, %v667_v52  ;;  %v564_v58 = vsel %vm292_vm6, %v561_v1, %v563_v2  ;;  %v566_v41 = vsel %vm292_vm6, %v563_v2, %v565_v10  ;;  %v669_v45 = vsel %vm82_vm0, %v666_v9, %v668_v11  ;;  %v671_v13 = vsel %vm82_vm0, %v668_v11, %v670_v12 }
 0x1ea   :  { %1589 = vmatmul.mubr.msk.f32.vlgmr.msra.gmra.mxu1 %vm191_vm4, %v564_v58  ;;  %vm789_vm0 = vcmask 130048  }
 0x1eb   :  { %1591 = vmatprep.mubr.msk.f32.mxu1 %vm191_vm4, %v566_v41 }
 0x1ec   :  { %1597 = vmatmul.mubr.msk.f32.vlgmr.msra.gmra.mxu0 %vm191_vm4, %v669_v45 }
 0x1ed   :  { %1599 = vmatprep.mubr.msk.f32.mxu0 %vm191_vm4, %v671_v13  ;;  %1614 = vmatpush3.msra.mxu0 %v969_v16 }
 0x1ee   :  { %1592 = vmatmul.mubr.msk.f32.gmra.mxu1 %vm191_vm4, %v565_v10  ;;  %1615 = vmatprep.subr.mxu0 %v1684_v29 }
 0x1ef   :  { %1610 = vmatprep.mubr.msk.f32.mxu1 %vm879_vm12, %v877_v15 }
 0x1f0   :  { %1600 = vmatmul.mubr.msk.f32.gmra.mxu0 %vm191_vm4, %v670_v12  ;;  %vm1428_vm4 = vcmask 254976  }
 0x1f1   :  { %1617 = vmatprep.mubr.msk.f32.mxu0 %vm1685_vm3, %v1684_v29 }
 0x2a4   :  { %v1582_v17 = vpop.f32.mrf.mxu0 }
 0x2a5   :  { %v556_v20 = vadd.f32 %v1582_v17, %v1463_v18 }
 0x2a6   :  { %v532_v26 = vpop.f32.mrf.mxu0 }
 0x2a7   :  { %v555_v23 = vadd.f32 %v1463_v18, %v532_v26  ;;  %v26_v26 = vld [vmem:[%s2024_s4 + $0x82] sm:$0x1] }
 0x2a8   :  { %v1585_v19 = vpop.f32.mrf.mxu0 }
 0x2a9   :  { %v558_v32 = vadd.f32 %v1585_v19, %v1463_v18 }
 0x2aa   :  { %v542_v21 = vpop.f32.mrf.mxu0  ;;  %v1590_v22 = vpop.f32.mrf.mxu1 }
 0x2ab   :  { %v661_v24 = vadd.f32 %v1590_v22, %v556_v20  ;;  %v557_v43 = vadd.f32 %v1463_v18, %v542_v21  ;;  %v27_v21 = vld [vmem:[%s2024_s4 + $0x83] sm:$0x1] }
 0x2ac   :  { %v641_v25 = vpop.f32.mrf.mxu1  ;;  %v1598_v28 = vpop.f32.mrf.mxu0 }
 0x2ad   :  { %v660_v33 = vadd.f32 %v641_v25, %v555_v23  ;;  %v766_v35 = vadd.f32 %v1598_v28, %v661_v24  ;;  %v870_v28 = vand.u32 1, %v1854_v31 }
 0x2ae   :  { %v1593_v37 = vpop.f32.mrf.mxu1  ;;  %v746_v38 = vpop.f32.mrf.mxu0 }
 0x2af   :  { %v786_v39 = vmul.f32 %v782_v30, %v766_v35  ;;  %v663_v40 = vadd.f32 %v1593_v37, %v558_v32  ;;  %v765_v42 = vadd.f32 %v746_v38, %v660_v33 }
 0x2b0   :  { %v651_v44 = vpop.f32.mrf.mxu1  ;;  %v1601_v46 = vpop.f32.mrf.mxu0 }
 0x2b1   :  { %v806_v47 = vmul.f32 %v786_v39, %v786_v39  ;;  %v805_v49 = vmul.f32 %v765_v42, %v765_v42  ;;  %v791_v50 = vsel %vm789_vm0, %v786_v39, 0.0  ;;  %v790_v51 = vsel %vm789_vm0, %v765_v42, 0.0 }
 0x2b2   :  { %v662_v53 = vadd.f32 %v651_v44, %v557_v43  ;;  %v768_v54 = vadd.f32 %v1601_v46, %v663_v40  ;;  %v756_v55 = vpop.f32.mrf.mxu0  ;;  %v792_v60 = vadd.f32 %v791_v50, %v790_v51  ;;  %v872_v44 = vmul.u32 14, %v870_v28 }
 0x2b3   :  { %v810_v56 = vsel %vm789_vm0, %v806_v47, 0.0  ;;  %v809_v57 = vsel %vm789_vm0, %v805_v49, 0.0 }
 0x2b4   :  { %v767_v59 = vadd.f32 %v756_v55, %v662_v53  ;;  %v808_v61 = vmul.f32 %v768_v54, %v768_v54  ;;  %v811_v0 = vadd.f32 %v810_v56, %v809_v57  ;;  %v796_v3 = vsel %vm795_vm1, %v768_v54, 0.0 }
 0x2b6   :  { %v793_v62 = vsel %vm789_vm0, %v767_v59, 0.0  ;;  %v807_v63 = vmul.f32 %v767_v59, %v767_v59  ;;  %v814_v7 = vsel %vm795_vm1, %v808_v61, 0.0 }
 0x2b7   :  { %v794_v1 = vadd.f32 %v793_v62, %v792_v60 }
 0x2b8   :  { %v812_v4 = vsel %vm789_vm0, %v807_v63, 0.0  ;;  %v1048_v63 = vld [vmem:[%s2024_s4 + $0x10] sm:$0xff] }
 0x2b9   :  { %v797_v5 = vadd.f32 %v796_v3, %v794_v1  ;;  %v813_v6 = vadd.f32 %v812_v4, %v811_v0  ;;  %v964_v1 = vld [vmem:[%s2023_s3] sm:$0xff] }
 0x2bb   :  { %v798_v8 = vrot.slane %v797_v5, 4  ;;  %v815_v9 = vadd.f32 %v814_v7, %v813_v6  ;;  %v1124_v7 = vld [vmem:[%s2024_s4 + $0x20] sm:$0xff] }
 0x2bd   :  { %v799_v10 = vadd.f32 %v798_v8, %v797_v5  ;;  %v816_v2 = vrot.slane %v815_v9, 4  ;;  %v1125_v5 = vld [vmem:[%s2024_s4 + $0x28] sm:$0xff]  ;;  %v1201_v8 = vld [vmem:[%s2024_s4 + $0x38] sm:$0xff] }
 0x2bf   :  { %v800_v11 = vrot.slane %v799_v10, 2  ;;  %v817_v52 = vadd.f32 %v816_v2, %v815_v9  ;;  %v965_v2 = vld [vmem:[%s2023_s3 + $0x8] sm:$0xf] }
 0x2c1   :  { %v801_v58 = vadd.f32 %v800_v11, %v799_v10  ;;  %v818_v41 = vrot.slane %v817_v52, 2  ;;  %v1200_v10 = vld [vmem:[%s2024_s4 + $0x30] sm:$0xff]  ;;  %v1277_v11 = vld [vmem:[%s2024_s4 + $0x48] sm:$0xff] }
 0x2c3   :  { %v802_v12 = vrot.slane %v801_v58, 1  ;;  %v819_v45 = vadd.f32 %v818_v41, %v817_v52 }
 0x2c5   :  { %v803_v13 = vadd.f32 %v802_v12, %v801_v58  ;;  %v820_v34 = vrot.slane %v819_v45, 1  ;;  %v1276_v58 = vld [vmem:[%s2024_s4 + $0x40] sm:$0xff]  ;;  %v1353_v12 = vld [vmem:[%s2024_s4 + $0x58] sm:$0xff] }
 0x2c7   :  { %v804_v36 = vmul.f32 0.03846154, %v803_v13  ;;  %v821_v14 = vadd.f32 %v820_v34, %v819_v45  ;;  %v1352_v45 = vld [vmem:[%s2024_s4 + $0x50] sm:$0xff]  ;;  %v1476_v34 = vld [vmem:[%s2024_s4 + $0x84] ss:$0 sm:$0xff] }
 0x2c9   :  { %v822_v15 = vmul.f32 0.03846154, %v821_v14  ;;  %v823_v16 = vmul.f32 %v804_v36, %v804_v36 }
 0x2cb   :  { %v824_v17 = vsub.f32 %v822_v15, %v823_v16 }
 0x2cd   :  { %v825_v18 = vadd.f32 1e-05, %v824_v17 }
 0x2cf   :  { %1660 = vrsqrt.f32 %v825_v18 }
 0x2dc   :  { %v1661_v19 = vpop.eup %1660 }
 0x2dd   :  { %v827_v20 = vmul.f32 %v1661_v19, %v26_v26 }
 0x2df   :  { %v831_v22 = vrot.slane %v827_v20, %v1835_v48  ;;  %v836_v23 = vmul.f32 %v827_v20, %v804_v36 }
 0x2e1   :  { %v837_v24 = vsub.f32 %v27_v21, %v836_v23  ;;  %v834_v25 = vmul.f32 %v831_v22, %v767_v59  ;;  %v835_v30 = vmul.f32 %v831_v22, %v768_v54  ;;  %v833_v33 = vmul.f32 %v831_v22, %v766_v35 }
 0x2e2   :  { %v832_v37 = vmul.f32 %v831_v22, %v765_v42 }
 0x2e3   :  { %v841_v32 = vrot.slane %v837_v24, %v1835_v48  ;;  %v874_v48 = vadd.s32 %v872_v44, %v1854_v31  ;;  %v968_v31 = vld [vmem:[%s2024_s4] sm:$0xff] }
 0x2e4   :  { %1616 = vmatpush3.msra.mxu0 %v968_v31 }
 0x2e5   :  { %v845_v38 = vadd.f32 %v841_v32, %v835_v30  ;;  %v844_v39 = vadd.f32 %v841_v32, %v834_v25  ;;  %v843_v40 = vadd.f32 %v841_v32, %v833_v33  ;;  %v842_v43 = vadd.f32 %v841_v32, %v832_v37  ;;  %1627 = vmatprep.subr.mxu0 %v1684_v29 }
 0x2e6   :  { %vm876_vm2 = vcmp.eq.s32.totalorder %v1780_v27, %v874_v48  ;;  %v1049_v27 = vld [vmem:[%s2024_s4 + $0x18] sm:$0xff]  ;;  %s1662_s4 = scalar_lea.vmem %s1437_s0, 32 }
 0x2e7   :  { %v849_v46 = vmax.f32 %v845_v38, 0.0  ;;  %v848_v47 = vmax.f32 %v844_v39, 0.0  ;;  %v847_v49 = vmax.f32 %v843_v40, 0.0  ;;  %v846_v50 = vmax.f32 %v842_v43, 0.0  ;;  %p1663_p0 = scmp.ne.s32.totalorder %s1437_s0, %s1662_s4  ;;  %p1668_p2 = scmp.lt.s32.totalorder %s1662_s4, %s1662_s4 }
 0x2e8   :  { %v878_v62 = vsel %vm876_vm2, 1.0, %v1684_v29 }
 0x2e9   :  { %v859_v51 = vrot.slane %v849_v46, 1  ;;  %v857_v53 = vrot.slane %v848_v47, 1  ;;  %v855_v55 = vrot.slane %v847_v49, 1  ;;  %v854_v56 = vrot.slane %v846_v50, 1  ;;  %p1669_p3 = por %p1668_p2, %p1667_p1 }
 0x2eb   :  { %v868_v57 = vmax.f32 %v849_v46, %v859_v51  ;;  %v860_v54 = vsel %vm292_vm6, %v857_v53, %v859_v51  ;;  %v858_v42 = vsel %vm292_vm6, %v855_v55, %v857_v53  ;;  %v856_v59 = vsel %vm292_vm6, %v854_v56, %v855_v55  ;;  %p1670_p4 = pnand %p1669_p3, %p1663_p0 }
 0x2ec   :  { %v867_v35 = vmax.f32 %v848_v47, %v860_v54  ;;  %v866_v60 = vmax.f32 %v847_v49, %v858_v42  ;;  %v865_v61 = vmax.f32 %v846_v50, %v856_v59 }
 0x2ed   :  { %1602 = vmatprep.subr.msk.mxu1 %vm356_vm7, %v868_v57 }
 0x2ee   :  { %1603 = vmatpush3.msk.msra.mxu1 %vm356_vm7, %v868_v57 }
 0x2ef   :  { %1604 = vmatprep.subr.mxu1 %v867_v35 }
 0x2f0   :  { %1605 = vmatpush3.msra.mxu1 %v867_v35 }
 0x2f1   :  { %1606 = vmatprep.subr.mxu1 %v866_v60 }
 0x2f2   :  { %1607 = vmatpush3.msra.mxu1 %v866_v60 }
 0x2f3   :  { %1608 = vmatprep.subr.mxu1 %v865_v61 }
 0x2f4   :  { %1609 = vmatpush3.msra.mxu1 %v865_v61 }
 0x2f5   :  { %1611 = vmatmul.mubr.msk.f32.vlgmr.msra.gmra.mxu1 %vm879_vm12, %v878_v62  ;;  %1620 = vmatprep.subr.mxu1 %v1684_v29 }
 0x2f6   :  { %1621 = vmatpush3.msra.mxu1 %v1049_v27  ;;  %1624 = vmatprep.mubr.msk.f32.mxu1 %vm1685_vm3, %v1684_v29 }
 0x2f7   :  { %1622 = vmatprep.subr.mxu1 %v1684_v29 }
 0x2f8   :  { %1623 = vmatpush3.msra.mxu1 %v1048_v63 }
 0x2f9   :  { %1634 = vmatprep.subr.mxu1 %v1684_v29 }
 0x3b5   :  { %v1612_v0 = vpop.f32.mrf.mxu1 }
 0x3b6   :  { %v967_v41 = vmul.f32 %v1612_v0, %v965_v2 }
 0x3b7   :  { %v955_v3 = vpop.f32.mrf.mxu1 }
 0x3b8   :  { %v966_v4 = vmul.f32 %v964_v1, %v955_v3  ;;  %v1354_v13 = vrot.slane %v967_v41, 2 }
 0x3ba   :  { %v1050_v6 = vrot.slane %v966_v4, 2  ;;  %1618 = vmatmul.mubr.msk.f32.vlgmr.msra.gmra.mxu0 %vm789_vm0, %v966_v4  ;;  %v1126_v9 = vrot.slane %v966_v4, 4  ;;  %v1202_v52 = vrot.slane %v966_v4, 6 }
 0x3bb   :  { %1628 = vmatpush3.msra.mxu0 %v1125_v5  ;;  %1631 = vmatprep.mubr.msk.f32.mxu0 %vm1685_vm3, %v1684_v29 }
 0x3bc   :  { %1625 = vmatmul.mubr.msk.f32.vlgmr.msra.gmra.mxu1 %vm789_vm0, %v1050_v6  ;;  %1629 = vmatprep.subr.mxu0 %v1684_v29 }
 0x3bd   :  { %1630 = vmatpush3.msra.mxu0 %v1124_v7  ;;  %1635 = vmatpush3.msra.mxu1 %v1201_v8 }
 0x3be   :  { %1632 = vmatmul.mubr.msk.f32.vlgmr.msra.gmra.mxu0 %vm789_vm0, %v1126_v9  ;;  %1636 = vmatprep.subr.mxu1 %v1684_v29 }
 0x3bf   :  { %1641 = vmatprep.subr.mxu0 %v1684_v29  ;;  %1637 = vmatpush3.msra.mxu1 %v1200_v10 }
 0x3c0   :  { %1638 = vmatprep.mubr.msk.f32.mxu1 %vm1685_vm3, %v1684_v29  ;;  %1642 = vmatpush3.msra.mxu0 %v1277_v11 }
 0x3c1   :  { %1639 = vmatmul.mubr.msk.f32.vlgmr.msra.gmra.mxu1 %vm789_vm0, %v1202_v52  ;;  %1643 = vmatprep.subr.mxu0 %v1684_v29 }
 0x3c2   :  { %1648 = vmatprep.subr.mxu1 %v1684_v29  ;;  %1644 = vmatpush3.msra.mxu0 %v1276_v58 }
 0x3c3   :  { %1645 = vmatprep.mubr.msk.f32.mxu0 %vm1685_vm3, %v1684_v29  ;;  %1649 = vmatpush3.msra.mxu1 %v1353_v12 }
 0x3c4   :  { %1646 = vmatmul.mubr.msk.f32.vlgmr.msra.gmra.mxu0 %vm789_vm0, %v967_v41  ;;  %1650 = vmatprep.subr.mxu1 %v1684_v29 }
 0x3c5   :  { %1651 = vmatpush3.msra.mxu1 %v1352_v45  ;;  %1652 = vmatprep.mubr.msk.f32.mxu1 %vm1685_vm3, %v1684_v29 }
 0x3c6   :  { %1653 = vmatmul.mubr.msk.f32.vlgmr.msra.gmra.mxu1 %vm789_vm0, %v1354_v13 }
 0x47a   :  { %v1039_v36 = vpop.f32.mrf.mxu0 }
 0x47b   :  { %v1047_v14 = vadd.f32 %v1476_v34, %v1039_v36 }
 0x47c   :  { %v1619_v15 = vpop.f32.mrf.mxu0  ;;  %v1119_v16 = vpop.f32.mrf.mxu1 }
 0x47d   :  { %v1123_v17 = vadd.f32 %v1119_v16, %v1047_v14 }
 0x47e   :  { %v1626_v18 = vpop.f32.mrf.mxu1  ;;  %v1195_v26 = vpop.f32.mrf.mxu0 }
 0x47f   :  { %v1199_v19 = vadd.f32 %v1195_v26, %v1123_v17 }
 0x480   :  { %v1633_v20 = vpop.f32.mrf.mxu0 }
 0x481   :  { %v1271_v21 = vpop.f32.mrf.mxu1 }
 0x482   :  { %v1275_v22 = vadd.f32 %v1271_v21, %v1199_v19 }
 0x483   :  { %v1640_v23 = vpop.f32.mrf.mxu1 }
 0x484   :  { %v1347_v24 = vpop.f32.mrf.mxu0 }
 0x485   :  { %v1351_v29 = vadd.f32 %v1347_v24, %v1275_v22 }
 0x486   :  { %v1647_v25 = vpop.f32.mrf.mxu0  ;;  %v1423_v28 = vpop.f32.mrf.mxu1 }
 0x487   :  { %v1427_v30 = vadd.f32 %v1423_v28, %v1351_v29 }
 0x488   :  { %v1654_v32 = vpop.f32.mrf.mxu1 }
 0x489   :  { %1429 = vst.msk [vmem:[#allocation2] sm:$0x3] %vm1428_vm4, %v1427_v30 }
 0x48a   :  { %1673 = shalt.err (!%p1670_p4)
}
 0x48b   :  { %1439 = dma.vmem_to_hbm [thread:$0]  %s1437_s0, 32, %s2025_s5, [#allocation3]  }
 0x48c   :  { %1682 = dma.done.wait [#allocation3], 32  }
 0x48d   :  { %1683 = vsyncadd [#allocation3], 4294967264 }
 0x48e   :  { %1443 = vsyncpa [#allocation3], 1 }

</bundles_post_ra>
